<compile_context>
chip_gen: v6e
topology: v6e:2x2x1
jax: 0.10.0
libtpu: 0.0.40
codegen_flags: <defaults>
</compile_context>

<pallas_src>
import jax
import jax.numpy as jnp
from jax.experimental import pallas as pl
from jax.experimental.pallas import tpu as pltpu


# ------------- Kernel 1: ConvTranspose2d(kernel=2, stride=2) as one matmul ----------
def convt_kernel(x1_ref, wt_ref, bt_ref, o_ref):
    # x1_ref: (H1*W1, Cin), wt_ref: (Cin, 4*Chalf), bt_ref: (1, 4*Chalf)
    o_ref[...] = (jnp.dot(x1_ref[...], wt_ref[...],
                          preferred_element_type=jnp.float32) + bt_ref[...])


# ------- Kernel 2: concat(skip, up) + (Conv3x3 -> BN -> ReLU) x2, im2col form -------
def double_conv_kernel(x2_ref, up_ref, w1_ref, s1_ref, b1_ref,
                       w2_ref, s2_ref, b2_ref, o_ref,
                       pad1_ref, pad2_ref, im1_ref, im2_ref):
    H2, W2, C2 = x2_ref.shape
    Chalf = up_ref.shape[2]
    Ccat = C2 + Chalf
    Cmid = w1_ref.shape[1]
    M = H2 * W2

    # Zero only the 1-pixel halo each step (interior is fully overwritten below).
    for pref, C in ((pad1_ref, Ccat), (pad2_ref, Cmid)):
        zrow = jnp.zeros((1, W2 + 2, C), jnp.float32)
        zcol = jnp.zeros((H2, 1, C), jnp.float32)
        pref[0:1, :, :] = zrow
        pref[H2 + 1:H2 + 2, :, :] = zrow
        pref[1:H2 + 1, 0:1, :] = zcol
        pref[1:H2 + 1, W2 + 1:W2 + 2, :] = zcol

    # torch.cat([x2, x1_up], dim=channel) written straight into the padded interior.
    pad1_ref[1:H2 + 1, 1:W2 + 1, 0:C2] = x2_ref[...]
    pad1_ref[1:H2 + 1, 1:W2 + 1, C2:Ccat] = up_ref[...]

    def im2col(pad_ref, im_ref, C):
        # 9 shifted slabs -> one (M, 9*C) matrix => single MXU matmul per conv.
        for dy in range(3):
            for dx in range(3):
                t = dy * 3 + dx
                slab = pad_ref[dy:dy + H2, dx:dx + W2, :]            # (H2, W2, C)
                im_ref[:, t * C:(t + 1) * C] = slab.reshape(M, C)

    # conv1 (3x3, pad 1, no bias) + folded BN + ReLU
    im2col(pad1_ref, im1_ref, Ccat)
    y1 = jnp.dot(im1_ref[...], w1_ref[...], preferred_element_type=jnp.float32)
    y1 = jnp.maximum(y1 * s1_ref[...] + b1_ref[...], 0.0)           # (M, Cmid)
    pad2_ref[1:H2 + 1, 1:W2 + 1, :] = y1.reshape(H2, W2, Cmid)

    # conv2 (3x3, pad 1, no bias) + folded BN + ReLU; output stored as (Cout, M)
    im2col(pad2_ref, im2_ref, Cmid)
    y2 = jnp.dot(im2_ref[...], w2_ref[...], preferred_element_type=jnp.float32)
    y2t = y2.T                                                       # (Cout, M) lane-dense
    o_ref[...] = jnp.maximum(y2t * s2_ref[...] + b2_ref[...], 0.0)


def upscaling_forward(x1_nchw, x2_nchw, params, eps=1e-5):
    wt, bt, w1, g1, be1, m1, v1, w2, g2, be2, m2, v2 = params
    N, Cin, H1, W1 = x1_nchw.shape
    _, C2, H2, W2 = x2_nchw.shape
    Chalf = wt.shape[1]                 # = Cin // 2
    Ccat = C2 + Chalf
    Cmid = w1.shape[0]
    Cout = w2.shape[0]
    M = H2 * W2
    f32 = jnp.float32

    # --- ConvTranspose weights: PyTorch (Cin, Chalf, 2, 2) -> (Cin, 4*Chalf) ---------
    wt_f = jnp.transpose(wt, (0, 2, 3, 1)).reshape(Cin, 4 * Chalf).astype(f32)
    bt_f = jnp.tile(bt.astype(f32), 4).reshape(1, 4 * Chalf)
    x1f = jnp.transpose(x1_nchw, (0, 2, 3, 1)).reshape(N, H1 * W1, Cin).astype(f32)

    up_blk = pl.pallas_call(
        convt_kernel,
        out_shape=jax.ShapeDtypeStruct((N, H1 * W1, 4 * Chalf), f32),
        grid_spec=pltpu.PrefetchScalarGridSpec(
            num_scalar_prefetch=0,
            grid=(N,),
            in_specs=[
                pl.BlockSpec((None, H1 * W1, Cin), lambda n: (n, 0, 0)),
                pl.BlockSpec((Cin, 4 * Chalf), lambda n: (0, 0)),
                pl.BlockSpec((1, 4 * Chalf), lambda n: (0, 0)),
            ],
            out_specs=pl.BlockSpec((None, H1 * W1, 4 * Chalf), lambda n: (n, 0, 0)),
        ),
        compiler_params=pltpu.CompilerParams(dimension_semantics=("parallel",)),
    )(x1f, wt_f, bt_f)

    # depth-to-space (pure layout plumbing): (N, H1*W1, 2*2*Chalf) -> (N, 2H1, 2W1, Chalf)
    up = up_blk.reshape(N, H1, W1, 2, 2, Chalf)
    up = jnp.transpose(up, (0, 1, 3, 2, 4, 5)).reshape(N, 2 * H1, 2 * W1, Chalf)

    # F.pad(x1, [dX//2, dX-dX//2, dY//2, dY-dY//2]) to match the skip connection.
    dY = H2 - 2 * H1
    dX = W2 - 2 * W1
    up = jnp.pad(up, ((0, 0), (dY // 2, dY - dY // 2), (dX // 2, dX - dX // 2), (0, 0)))

    # conv weights in im2col layout; BatchNorm folded to per-channel scale/bias.
    w1k = jnp.transpose(w1, (2, 3, 1, 0)).reshape(9 * Ccat, Cmid).astype(f32)
    w2k = jnp.transpose(w2, (2, 3, 1, 0)).reshape(9 * Cmid, Cout).astype(f32)
    inv1 = (g1 / jnp.sqrt(v1 + eps)).astype(f32)
    inv2 = (g2 / jnp.sqrt(v2 + eps)).astype(f32)
    s1 = inv1.reshape(1, Cmid)
    b1 = (be1.astype(f32) - m1.astype(f32) * inv1).reshape(1, Cmid)
    s2 = inv2.reshape(Cout, 1)
    b2 = (be2.astype(f32) - m2.astype(f32) * inv2).reshape(Cout, 1)

    x2n = jnp.transpose(x2_nchw, (0, 2, 3, 1)).astype(f32)

    out_flat = pl.pallas_call(
        double_conv_kernel,
        out_shape=jax.ShapeDtypeStruct((N, Cout, M), f32),
        grid_spec=pltpu.PrefetchScalarGridSpec(
            num_scalar_prefetch=0,
            grid=(N,),
            in_specs=[
                pl.BlockSpec((None, H2, W2, C2), lambda n: (n, 0, 0, 0)),
                pl.BlockSpec((None, H2, W2, Chalf), lambda n: (n, 0, 0, 0)),
                pl.BlockSpec((9 * Ccat, Cmid), lambda n: (0, 0)),
                pl.BlockSpec((1, Cmid), lambda n: (0, 0)),
                pl.BlockSpec((1, Cmid), lambda n: (0, 0)),
                pl.BlockSpec((9 * Cmid, Cout), lambda n: (0, 0)),
                pl.BlockSpec((Cout, 1), lambda n: (0, 0)),
                pl.BlockSpec((Cout, 1), lambda n: (0, 0)),
            ],
            out_specs=pl.BlockSpec((None, Cout, M), lambda n: (n, 0, 0)),
            scratch_shapes=[
                pltpu.VMEM((H2 + 2, W2 + 2, Ccat), f32),   # padded concat buffer
                pltpu.VMEM((H2 + 2, W2 + 2, Cmid), f32),   # padded conv2 input
                pltpu.VMEM((M, 9 * Ccat), f32),            # im2col for conv1
                pltpu.VMEM((M, 9 * Cmid), f32),            # im2col for conv2
            ],
        ),
        compiler_params=pltpu.CompilerParams(dimension_semantics=("parallel",)),
    )(x2n, up, w1k, s1, b1, w2k, s2, b2)

    return out_flat.reshape(N, Cout, H2, W2)                        # NCHW


def reference_forward(x1, x2, params, eps=1e-5):
    """Pure-JAX reference (same eval-mode BN semantics)."""
    wt, bt, w1, g1, be1, m1, v1, w2, g2, be2, m2, v2 = params
    # ConvTranspose2d(k=2, s=2)  ==  lhs-dilated conv with flipped / transposed kernel
    up = jax.lax.conv_general_dilated(
        x1, jnp.transpose(jnp.flip(wt, (2, 3)), (1, 0, 2, 3)),
        window_strides=(1, 1), padding=((1, 1), (1, 1)),
        lhs_dilation=(2, 2), dimension_numbers=("NCHW", "OIHW", "NCHW"))
    up = up + bt[None, :, None, None]
    dY = x2.shape[2] - up.shape[2]
    dX = x2.shape[3] - up.shape[3]
    up = jnp.pad(up, ((0, 0), (0, 0), (dY // 2, dY - dY // 2), (dX // 2, dX - dX // 2)))
    x = jnp.concatenate([x2, up], axis=1)

    def conv_bn_relu(x, w, g, be, m, v):
        y = jax.lax.conv_general_dilated(
            x, w, window_strides=(1, 1), padding=((1, 1), (1, 1)),
            dimension_numbers=("NCHW", "OIHW", "NCHW"))
        s = g / jnp.sqrt(v + eps)
        return jnp.maximum(y * s[None, :, None, None] + (be - m * s)[None, :, None, None], 0.0)

    y = conv_bn_relu(x, w1, g1, be1, m1, v1)
    return conv_bn_relu(y, w2, g2, be2, m2, v2)


if __name__ == "__main__":
    key = jax.random.PRNGKey(0)
    N = 2
    in_channels = 4                  # x1 channels (UpScaling(in_channels=4, out_channels=8))
    out_channels = 8                 # = mid channels
    Chalf = in_channels // 2
    H1 = W1 = 8                      # x1 spatial (upsampled to 16)
    H2 = W2 = 16                     # skip-connection spatial
    C2 = Chalf                       # skip-connection channels (standard U-Net)
    Ccat = C2 + Chalf                # == in_channels

    ks = jax.random.split(key, 14)
    x1 = jax.random.normal(ks[0], (N, in_channels, H1, W1), jnp.float32)
    x2 = jax.random.normal(ks[1], (N, C2, H2, W2), jnp.float32)
    wt = jax.random.normal(ks[2], (in_channels, Chalf, 2, 2), jnp.float32) * 0.2
    bt = jax.random.normal(ks[3], (Chalf,), jnp.float32) * 0.1
    w1 = jax.random.normal(ks[4], (out_channels, Ccat, 3, 3), jnp.float32) * 0.1
    g1 = jax.random.uniform(ks[5], (out_channels,), jnp.float32, 0.5, 1.5)
    be1 = jax.random.normal(ks[6], (out_channels,), jnp.float32) * 0.1
    m1 = jax.random.normal(ks[7], (out_channels,), jnp.float32) * 0.1
    v1 = jax.random.uniform(ks[8], (out_channels,), jnp.float32, 0.5, 1.5)
    w2 = jax.random.normal(ks[9], (out_channels, out_channels, 3, 3), jnp.float32) * 0.1
    g2 = jax.random.uniform(ks[10], (out_channels,), jnp.float32, 0.5, 1.5)
    be2 = jax.random.normal(ks[11], (out_channels,), jnp.float32) * 0.1
    m2 = jax.random.normal(ks[12], (out_channels,), jnp.float32) * 0.1
    v2 = jax.random.uniform(ks[13], (out_channels,), jnp.float32, 0.5, 1.5)
    params = (wt, bt, w1, g1, be1, m1, v1, w2, g2, be2, m2, v2)

    out = upscaling_forward(x1, x2, params)
    out = jax.block_until_ready(out)

    ref = reference_forward(x1, x2, params)
    assert out.shape == (N, out_channels, H2, W2), out.shape
    max_err = float(jnp.max(jnp.abs(out - ref)))
    assert max_err < 2e-3, f"max abs err {max_err}"
    print("KERNEL_OK")
</pallas_src>

<mosaic_0001>
module attributes {stable_mosaic.version = 11 : i64} {
  func.func @convt_kernel(%arg0: i32, %arg1: memref<1x64x4xf32, #tpu.memory_space<vmem>>, %arg2: memref<4x8xf32, #tpu.memory_space<vmem>>, %arg3: memref<1x8xf32, #tpu.memory_space<vmem>>, %arg4: memref<1x64x8xf32, #tpu.memory_space<vmem>>) attributes {dimension_semantics = [#tpu.dimension_semantics<parallel>], iteration_bounds = array<i64: 2>, scalar_prefetch = 0 : i64, scratch_operands = 0 : i64, tpu.core_type = #tpu.core_type<tc>, window_params = [{transform_indices = @transform_0, window_bounds = array<i64: 1, 64, 4>}, {pipeline_mode = #tpu.pipeline_mode<synchronous>, transform_indices = @transform_1, window_bounds = array<i64: 4, 8>}, {pipeline_mode = #tpu.pipeline_mode<synchronous>, transform_indices = @transform_2, window_bounds = array<i64: 1, 8>}, {transform_indices = @transform_3, window_bounds = array<i64: 1, 64, 8>}]} {
    %c0 = arith.constant 0 : index
    %c0_0 = arith.constant 0 : index
    %c0_1 = arith.constant 0 : index
    %0 = vector.load %arg1[%c0, %c0_0, %c0_1] : memref<1x64x4xf32, #tpu.memory_space<vmem>>, vector<1x64x4xf32>
    %1 = vector.shape_cast %0 : vector<1x64x4xf32> to vector<64x4xf32>
    %c0_2 = arith.constant 0 : index
    %c0_3 = arith.constant 0 : index
    %2 = vector.load %arg2[%c0_2, %c0_3] : memref<4x8xf32, #tpu.memory_space<vmem>>, vector<4x8xf32>
    %cst = arith.constant dense<0.000000e+00> : vector<64x8xf32>
    %3 = tpu.matmul %1, %2, %cst {dimension_numbers = #tpu.dot_dimension_numbers<[1], [0], [0], [1], [0, 0, 1, 1], [], []>} : vector<64x4xf32>, vector<4x8xf32>, vector<64x8xf32> -> vector<64x8xf32>
    %c0_4 = arith.constant 0 : index
    %c0_5 = arith.constant 0 : index
    %4 = vector.load %arg3[%c0_4, %c0_5] : memref<1x8xf32, #tpu.memory_space<vmem>>, vector<1x8xf32>
    %5 = vector.broadcast %4 : vector<1x8xf32> to vector<64x8xf32>
    %6 = arith.addf %3, %5 : vector<64x8xf32>
    %c0_6 = arith.constant 0 : index
    %c0_7 = arith.constant 0 : index
    %c0_8 = arith.constant 0 : index
    %7 = vector.load %arg4[%c0_6, %c0_7, %c0_8] : memref<1x64x8xf32, #tpu.memory_space<vmem>>, vector<1x64x8xf32>
    %8 = vector.shape_cast %7 : vector<1x64x8xf32> to vector<64x8xf32>
    %9 = vector.shape_cast %6 : vector<64x8xf32> to vector<1x64x8xf32>
    tpu.vector_store %arg4[%c0_6, %c0_7, %c0_8], %9 {strides = array<i32>} : memref<1x64x8xf32, #tpu.memory_space<vmem>>, vector<1x64x8xf32>,
    return
  }
  func.func @transform_0(%arg0: i32) -> (i32, i32, i32) {
    %c0_i32 = arith.constant 0 : i32
    %c0_i32_0 = arith.constant 0 : i32
    %c0_i32_1 = arith.constant 0 : i32
    return %arg0, %c0_i32, %c0_i32_0 : i32, i32, i32
  }
  func.func @transform_1(%arg0: i32) -> (i32, i32) {
    %c0_i32 = arith.constant 0 : i32
    %c0_i32_0 = arith.constant 0 : i32
    %c0_i32_1 = arith.constant 0 : i32
    return %c0_i32, %c0_i32_0 : i32, i32
  }
  func.func @transform_2(%arg0: i32) -> (i32, i32) {
    %c0_i32 = arith.constant 0 : i32
    %c0_i32_0 = arith.constant 0 : i32
    %c0_i32_1 = arith.constant 0 : i32
    return %c0_i32, %c0_i32_0 : i32, i32
  }
  func.func @transform_3(%arg0: i32) -> (i32, i32, i32) {
    %c0_i32 = arith.constant 0 : i32
    %c0_i32_0 = arith.constant 0 : i32
    %c0_i32_1 = arith.constant 0 : i32
    return %arg0, %c0_i32, %c0_i32_0 : i32, i32, i32
  }
}

</mosaic_0001>

<bundles_post_ra>
// kernel: tpu_custom_call.1
= control target key start
LH: loop header
LB: loop body
LE: loop exit
PB: predicated region body
PF: predicated region fallthrough
CT: control target
= control target key end

     0   :  { %s469_s12 = smov 0   ;;  %s508_s0 = inlined_call_operand.vmem [shape: f32[2,64,4], index: 0, kind: input, shape index: {}]   ;;  %s509_s1 = inlined_call_operand.vmem [shape: f32[4,8], index: 1, kind: input, shape index: {}]   ;;  %s510_s2 = inlined_call_operand.vmem [shape: f32[1,8], index: 2, kind: input, shape index: {}]   ;;  %s511_s3 = inlined_call_operand.vmem [shape: f32[2,64,8], index: 3, kind: output, shape index: {}]  }
   0x1 LB: > { %s385_s13 = sadd.s32 4294967295, %s447_s12   ;;  %p389_p0 = scmp.ge.s32.totalorder %s447_s12, 1  ;;  %s447_s12 = sphi %s469_s12, %s13_s12  }
   0x2   : > { %p137_p1 = scmp.lt.s32.totalorder %s447_s12, 3 }
   0x4   : > { %p138_p2 = pnand %p389_p0, %p137_p1 }
   0x5   : > { %p161_p3 = scmp.lt.s32.totalorder (!%p138_p2), %s385_s13, 1 }
   0x6   : > { %141 = sbr.rel (%p138_p2) target bundleno = 219 (0xdb), region = 32 }
   0xb   : > { %v179_v0 = vld [vmem:[%s509_s1] sm:$0xf]  ;;  %vm212_vm0 = vcmask 1043456   ;;  %s513_s13 = smov (!%p161_p3, %s385_s13), 1  ;;  %vm187_vm1 = vcmask 31744   ;;  %vm321_vm2 = vcmask 64512  }
   0xc   : > { %417 = vmatprep.subr.msk.mxu0 %vm212_vm0, %v179_v0  ;;  %431 = vmatprep.subr.msk.mxu1 %vm212_vm0, %v179_v0  ;;  %s406_s16 = sshll.u32 %s513_s13, 6  ;;  %v394_v9 = vld [vmem:[%s510_s2] ss:$0 sm:$0xff] }
   0xd   : > { %418 = vmatpush3.msk.msra.mxu0 %vm212_vm0, %v179_v0  ;;  %432 = vmatpush3.msk.msra.mxu1 %vm212_vm0, %v179_v0  ;;  %s165_s19 = scalar_lea.vmem %s508_s0, %s406_s16  ;;  %s170_s24 = scalar_lea.vmem %s511_s3, %s406_s16 }
   0xe   : > { %v171_v1 = vld [vmem:[%s165_s19] sm:$0xff]  ;;  %v172_v3 = vld [vmem:[%s165_s19 + $0x8] sm:$0xff]  ;;  %v173_v5 = vld [vmem:[%s165_s19 + $0x10] sm:$0xff] }
   0xf   : > { %v175_v2 = vld [vmem:[%s165_s19 + $0x20] sm:$0xff]  ;;  %419 = vmatprep.mubr.msk.f32.mxu0 %vm187_vm1, %v171_v1  ;;  %v176_v4 = vld [vmem:[%s165_s19 + $0x28] sm:$0xff]  ;;  %v177_v6 = vld [vmem:[%s165_s19 + $0x30] sm:$0xff] }
  0x10   : > { %425 = vmatprep.mubr.msk.f32.mxu1 %vm187_vm1, %v175_v2  ;;  %420 = vmatmul.mubr.msk.f32.vlgmr.msra.gmra.mxu0 %vm187_vm1, %v172_v3  ;;  %v174_v7 = vld [vmem:[%s165_s19 + $0x18] sm:$0xff] }
  0x11   : > { %426 = vmatmul.mubr.msk.f32.vlgmr.msra.gmra.mxu1 %vm187_vm1, %v176_v4  ;;  %422 = vmatprep.mubr.msk.f32.mxu0 %vm187_vm1, %v173_v5  ;;  %v178_v8 = vld [vmem:[%s165_s19 + $0x38] sm:$0xff] }
  0x12   : > { %428 = vmatprep.mubr.msk.f32.mxu1 %vm187_vm1, %v177_v6 }
  0x14   : > { %423 = vmatmul.mubr.msk.f32.gmra.mxu0 %vm187_vm1, %v174_v7 }
  0x15   : > { %429 = vmatmul.mubr.msk.f32.gmra.mxu1 %vm187_vm1, %v178_v8 }
  0xd0   : > { %v421_v10 = vpop.f32.mrf.mxu0 }
  0xd1   : > { %v427_v11 = vpop.f32.mrf.mxu1  ;;  %v288_v12 = vadd.f32 %v421_v10, %v394_v9 }
  0xd2   : > { %v308_v13 = vadd.f32 %v427_v11, %v394_v9  ;;  %v282_v14 = vpop.f32.mrf.mxu0 }
  0xd3   : > { %v302_v15 = vpop.f32.mrf.mxu1  ;;  %323 = vst.msk [vmem:[%s170_s24 + $0x8] sm:$0xff] %vm321_vm2, %v288_v12  ;;  %v283_v16 = vadd.f32 %v394_v9, %v282_v14 }
  0xd4   : > { %327 = vst.msk [vmem:[%s170_s24 + $0x28] sm:$0xff] %vm321_vm2, %v308_v13  ;;  %v303_v17 = vadd.f32 %v394_v9, %v302_v15  ;;  %v424_v18 = vpop.f32.mrf.mxu0 }
  0xd5   : > { %v430_v19 = vpop.f32.mrf.mxu1  ;;  %322 = vst.msk [vmem:[%s170_s24] sm:$0xff] %vm321_vm2, %v283_v16  ;;  %v298_v20 = vadd.f32 %v424_v18, %v394_v9 }
  0xd6   : > { %326 = vst.msk [vmem:[%s170_s24 + $0x20] sm:$0xff] %vm321_vm2, %v303_v17  ;;  %v318_v21 = vadd.f32 %v430_v19, %v394_v9  ;;  %v292_v22 = vpop.f32.mrf.mxu0 }
  0xd7   : > { %v312_v23 = vpop.f32.mrf.mxu1  ;;  %325 = vst.msk [vmem:[%s170_s24 + $0x18] sm:$0xff] %vm321_vm2, %v298_v20  ;;  %v293_v24 = vadd.f32 %v394_v9, %v292_v22 }
  0xd8   : > { %329 = vst.msk [vmem:[%s170_s24 + $0x38] sm:$0xff] %vm321_vm2, %v318_v21  ;;  %v313_v25 = vadd.f32 %v394_v9, %v312_v23 }
  0xd9   : > { %324 = vst.msk [vmem:[%s170_s24 + $0x10] sm:$0xff] %vm321_vm2, %v293_v24 }
  0xda   : > { %328 = vst.msk [vmem:[%s170_s24 + $0x30] sm:$0xff] %vm321_vm2, %v313_v25 }
  0xdb PF: > { %s13_s12 = sadd.s32 1, %s447_s12  }
  0xdc   : > { %p10_p4 = scmp.ge.s32.totalorder %s13_s12, 4  }
  0xde   :  { %12 = sbr.rel (!%p10_p4) target bundleno = 1 (0x1), region = 62 }

</bundles_post_ra>
